<compile_context>
chip_gen: v6e
topology: v6e:2x2x1
jax: 0.10.0
libtpu: 0.0.40
codegen_flags: <defaults>
</compile_context>

<pallas_src>
import jax
import jax.numpy as jnp
from jax.experimental import pallas as pl
from jax.experimental.pallas import tpu as pltpu


# ----------------------------------------------------------------------------
# Model configuration (consistent with the module ctor):
#   strided_list=[(1, 3, 8, 3)], basic_list=[(2, 3, 16, 3)],
#   simple_list=[(1, 1, 32, 1)], num_classes_base=10, omit_last_relu=True
# Input length = 3 * 3 * 3 = 27 samples so the embedder output has T == 1.
# ----------------------------------------------------------------------------
BLOCKS = [
    # name        K  S  pad  pool  Cin  Cout  activation
    dict(name="strided0", K=3, S=3, Pd=0, Pw=1, Cin=1,  Cout=8,  use_act=True),
    dict(name="basic0",   K=3, S=1, Pd=1, Pw=3, Cin=8,  Cout=16, use_act=True),
    dict(name="basic1",   K=3, S=1, Pd=1, Pw=3, Cin=16, Cout=16, use_act=True),
    dict(name="simple0",  K=1, S=1, Pd=0, Pw=1, Cin=16, Cout=32, use_act=False),  # omit_last_relu
]
NUM_CLASSES = 10
IN_CH = 1
IN_SAMPLES = 27
BATCH = 2

# Derived static shapes.
K0 = BLOCKS[0]["K"]                       # 3
C0 = BLOCKS[0]["Cout"]                    # 8
T0 = IN_SAMPLES // BLOCKS[0]["S"]         # 9   strided conv output length
C1 = BLOCKS[1]["Cout"]                    # 16
T1 = T0                                   # 9   basic0 conv output length (pad=1, s=1)
C2 = BLOCKS[2]["Cout"]                    # 16
T2 = T1 // BLOCKS[1]["Pw"]                # 3   after MaxPool(3, 3)
C3 = BLOCKS[3]["Cout"]                    # 32
T3 = T2 // BLOCKS[2]["Pw"]                # 1   after MaxPool(3, 3)
FEAT_DIM = C3 * T3                        # 32  Flatten(start_dim=-2) of (C, T)

# Packed-parameter buffer layout: weight blocks 8-row aligned, vectors last.
R_W0 = 0                                  # (3,  C0) strided0 weight (rows 0..2)
R_W1 = 8                                  # (24, C1) basic0 weight
R_W2 = 32                                 # (48, C2) basic1 weight
R_W3 = 80                                 # (16, C3) simple0 (1x1) weight
R_WC = 96                                 # (32, NC) classifier weight (pre-normalized, scaled)
R_V = 128                                 # 8 rows: h0,a0,h1,a1,h2,a2,h3,unused
P_ROWS = R_V + 8                          # 136
P_COLS = 32


# ----------------------------------------------------------------------------
# Value-level helpers (everything stays in vregs)
# ----------------------------------------------------------------------------
def _prelu(y, alpha):
    return jnp.where(y >= 0.0, y, alpha * y)


def _im2col_k3(y, T):
    """(B*T, C) activation -> (B*T, 3*C) im2col columns for a ksize-3,
    stride-1, pad-1 conv.  Per-sample zero padding is enforced with iota
    masks so taps never leak across the batch boundary."""
    BT, C = y.shape
    nb = BT // T
    zrow = jnp.zeros((1, C), jnp.float32)
    row = jax.lax.broadcasted_iota(jnp.int32, (BT, C), 0)

    prev = jnp.concatenate([zrow, y[:BT - 1, :]], axis=0)        # x[t-1]
    pmask = row == 0
    for b in range(1, nb):
        pmask = pmask | (row == b * T)
    prev = jnp.where(pmask, 0.0, prev)

    nxt = jnp.concatenate([y[1:, :], zrow], axis=0)              # x[t+1]
    nmask = row == (T - 1)
    for b in range(1, nb):
        nmask = nmask | (row == b * T + T - 1)
    nxt = jnp.where(nmask, 0.0, nxt)

    # Column-block order [k=0 (t-1), k=1 (t), k=2 (t+1)] matches the weight
    # flattening (k*Cin + ci) used host-side.
    return jnp.concatenate([prev, y, nxt], axis=-1)


def _maxpool3_rows(y):
    """MaxPool1d(kernel=3, stride=3) along rows: (3*G, C) -> (G, C).
    Groups never straddle a batch boundary (per-sample T is a multiple of 3)."""
    G = y.shape[0] // 3
    rows = [jnp.max(y[3 * g:3 * g + 3, :], axis=0, keepdims=True) for g in range(G)]
    return rows[0] if G == 1 else jnp.concatenate(rows, axis=0)


# ----------------------------------------------------------------------------
# Fused Pallas kernel (whole forward pass, single invocation, no grid)
# ----------------------------------------------------------------------------
def _fused_forward_kernel(x_ref, p_ref, o_ref):
    """Whole SampCNN forward (embedder + flatten + cos-sim head) for the full
    batch.  x_ref: (B*T0, K0) im2col of the strided conv (a free reshape of
    the NCW audio).  p_ref: (136, 32) packed parameter buffer (BN scale folded
    into weight columns, classifier weights pre-normalized & pre-scaled).
    o_ref: (B, NUM_CLASSES) logits."""
    f32 = jnp.float32

    # --- unpack parameters (static, 8-row-aligned slices of one DMA'd ref) ---
    w0 = p_ref[R_W0:R_W0 + K0 * IN_CH, 0:C0]          # (3, 8)
    w1 = p_ref[R_W1:R_W1 + 3 * C0, 0:C1]              # (24, 16)
    w2 = p_ref[R_W2:R_W2 + 3 * C1, 0:C2]              # (48, 16)
    w3 = p_ref[R_W3:R_W3 + C2, 0:C3]                  # (16, 32)
    wc = p_ref[R_WC:R_WC + FEAT_DIM, 0:NUM_CLASSES]   # (32, 10)
    h0 = p_ref[R_V + 0:R_V + 1, 0:C0]
    a0 = p_ref[R_V + 1:R_V + 2, 0:C0]
    h1 = p_ref[R_V + 2:R_V + 3, 0:C1]
    a1 = p_ref[R_V + 3:R_V + 4, 0:C1]
    h2 = p_ref[R_V + 4:R_V + 5, 0:C2]
    a2 = p_ref[R_V + 5:R_V + 6, 0:C2]
    h3 = p_ref[R_V + 6:R_V + 7, 0:C3]

    x0 = x_ref[...]                                   # (B*T0, 3)

    # ---- strided0: Conv1d(K=3, stride=3, pad=0) + BN + PReLU  (one dot) ----
    y0 = _prelu(jnp.dot(x0, w0, preferred_element_type=f32) + h0, a0)      # (18, 8)

    # ---- basic0: Conv1d(K=3, s=1, pad=1) + BN + PReLU + MaxPool(3,3) -------
    y1 = _prelu(jnp.dot(_im2col_k3(y0, T0), w1, preferred_element_type=f32) + h1, a1)  # (18, 16)
    p1 = _maxpool3_rows(y1)                                                 # (6, 16)

    # ---- basic1: Conv1d(K=3, s=1, pad=1) + BN + PReLU + MaxPool(3,3) -------
    y2 = _prelu(jnp.dot(_im2col_k3(p1, T2), w2, preferred_element_type=f32) + h2, a2)  # (6, 16)
    p2 = _maxpool3_rows(y2)                                                 # (2, 16)

    # ---- simple0: 1x1 Conv + folded BN.  Dropout is identity in eval mode;
    #      PReLU omitted (omit_last_relu=True).  T3 == 1, so each row is the
    #      torch.nn.Flatten(start_dim=-2) feature vector. ---------------------
    # TODO(synk): training-mode dropout in SampCNNSimple is not implemented (eval-mode no-op here).
    feat = jnp.dot(p2, w3, preferred_element_type=f32) + h3                 # (B, 32)

    # ---- WeightGenCls 'cos_sim' head: scale_cls * cos(feature, class weight).
    fn = feat * jax.lax.rsqrt(jnp.sum(feat * feat, axis=-1, keepdims=True) + 1e-12)
    o_ref[...] = jnp.dot(fn, wc, preferred_element_type=f32)


# ----------------------------------------------------------------------------
# Wrapper
# ----------------------------------------------------------------------------
def sampcnn_forward(x_ncw, packed_params):
    """x_ncw: (B, in_ch, T) float32 (PyTorch NCW layout)."""
    B = x_ncw.shape[0]
    assert x_ncw.shape == (B, IN_CH, IN_SAMPLES) and IN_CH == 1
    # First block is a strided conv with stride == ksize == 3, no padding and
    # in_ch == 1, so its im2col is a *free* contiguous reshape of the raw NCW
    # audio; the batch is folded straight into the M dimension.
    x0 = x_ncw.reshape(B * T0, K0 * IN_CH)

    vmem = pl.BlockSpec(memory_space=pltpu.MemorySpace.VMEM)
    return pl.pallas_call(
        _fused_forward_kernel,
        out_shape=jax.ShapeDtypeStruct((B, NUM_CLASSES), jnp.float32),
        in_specs=[vmem, vmem],
        out_specs=vmem,
    )(x0, packed_params)


# ----------------------------------------------------------------------------
# Parameter init (eval-mode BatchNorm) + host-side packing / folding
# ----------------------------------------------------------------------------
def init_params(key):
    blocks = []
    for i, blk in enumerate(BLOCKS):
        K, Cin, Cout = blk["K"], blk["Cin"], blk["Cout"]
        wk, bk, gk, bek, mk, vk = jax.random.split(jax.random.fold_in(key, i), 6)
        fan_in = float(Cin * K)
        w = jax.random.uniform(wk, (Cout, Cin, K), jnp.float32, -1.0, 1.0) / jnp.sqrt(fan_in)
        bias = jax.random.uniform(bk, (Cout,), jnp.float32, -0.1, 0.1)
        # eval-mode BatchNorm1d params, folded together with the conv bias
        gamma = 1.0 + 0.1 * jax.random.normal(gk, (Cout,), jnp.float32)
        beta = 0.1 * jax.random.normal(bek, (Cout,), jnp.float32)
        rmean = 0.05 * jax.random.normal(mk, (Cout,), jnp.float32)
        rvar = 1.0 + 0.1 * jax.random.uniform(vk, (Cout,), jnp.float32)
        s = gamma * jax.lax.rsqrt(rvar + 1e-5)
        scale = s.reshape(1, Cout)
        shift = (beta + (bias - rmean) * s).reshape(1, Cout)
        # Weight reshaped so patch rows (flattened as k*Cin + ci) @ w2 == Conv1d.
        w2 = jnp.transpose(w, (2, 1, 0)).reshape(K * Cin, Cout)
        alpha = jnp.full((1, Cout), 0.25, jnp.float32)   # nn.PReLU default init
        blocks.append(dict(w2=w2, scale=scale, shift=shift, alpha=alpha))

    ck = jax.random.fold_in(key, 1000)
    w_base = 0.1 * jax.random.normal(ck, (NUM_CLASSES, FEAT_DIM), jnp.float32)
    scale_cls = jnp.float32(10.0)                        # WeightGenCls scale parameter
    # Inference-time fold: scale * cos_sim(f, W) == normalize(f) @ (scale * normalize(W))^T
    wn = w_base * jax.lax.rsqrt(jnp.sum(w_base * w_base, axis=-1, keepdims=True) + 1e-12)
    wclsT = (scale_cls * wn).T                           # (FEAT_DIM, NUM_CLASSES)
    return dict(blocks=blocks, wclsT=wclsT)


def pack_params(params):
    """Fold BN scale into conv-weight columns and pack every parameter into
    one lane-padded (136, 32) buffer (single DMA into the kernel)."""
    b0, b1, b2, b3 = params["blocks"]

    def fold(bp):
        return bp["w2"] * bp["scale"]     # (K*Cin, Cout) * (1, Cout)

    buf = jnp.zeros((P_ROWS, P_COLS), jnp.float32)
    buf = buf.at[R_W0:R_W0 + K0 * IN_CH, :C0].set(fold(b0))
    buf = buf.at[R_W1:R_W1 + 3 * C0, :C1].set(fold(b1))
    buf = buf.at[R_W2:R_W2 + 3 * C1, :C2].set(fold(b2))
    buf = buf.at[R_W3:R_W3 + C2, :C3].set(fold(b3))
    buf = buf.at[R_WC:R_WC + FEAT_DIM, :NUM_CLASSES].set(params["wclsT"])
    buf = buf.at[R_V + 0, :C0].set(b0["shift"][0])
    buf = buf.at[R_V + 1, :C0].set(b0["alpha"][0])
    buf = buf.at[R_V + 2, :C1].set(b1["shift"][0])
    buf = buf.at[R_V + 3, :C1].set(b1["alpha"][0])
    buf = buf.at[R_V + 4, :C2].set(b2["shift"][0])
    buf = buf.at[R_V + 5, :C2].set(b2["alpha"][0])
    buf = buf.at[R_V + 6, :C3].set(b3["shift"][0])
    return buf


# ----------------------------------------------------------------------------
# Pure-JAX reference (validation only)
# ----------------------------------------------------------------------------
def _reference_forward(x_ncw, params):
    hi = jax.lax.Precision.HIGHEST
    x = jnp.transpose(x_ncw, (0, 2, 1)).astype(jnp.float32)        # (B, T, Cin)
    for blk, bp in zip(BLOCKS, params["blocks"]):
        K, S, Pd, Pw = blk["K"], blk["S"], blk["Pd"], blk["Pw"]
        B, T, Cin = x.shape
        xp = jnp.pad(x, ((0, 0), (Pd, Pd), (0, 0)))
        Tc = (T + 2 * Pd - K) // S + 1
        cols = jnp.stack([xp[:, t * S:t * S + K, :].reshape(B, K * Cin)
                          for t in range(Tc)], axis=1)             # (B, Tc, K*Cin)
        y = jnp.einsum("btk,kc->btc", cols, bp["w2"], precision=hi)
        y = y * bp["scale"] + bp["shift"]
        if blk["use_act"]:
            y = jnp.where(y >= 0.0, y, bp["alpha"] * y)
        Tp = Tc // Pw
        x = y[:, :Tp * Pw, :].reshape(B, Tp, Pw, -1).max(axis=2)
    emb = jnp.transpose(x, (0, 2, 1)).reshape(x.shape[0], -1)      # Flatten(start_dim=-2)
    fn = emb * jax.lax.rsqrt(jnp.sum(emb * emb, axis=-1, keepdims=True) + 1e-12)
    return jnp.dot(fn, params["wclsT"], precision=hi)


if __name__ == "__main__":
    key = jax.random.PRNGKey(0)
    pkey, xkey = jax.random.split(key)
    params = init_params(pkey)
    packed = pack_params(params)
    x = jax.random.normal(xkey, (BATCH, IN_CH, IN_SAMPLES), jnp.float32)  # NCW audio

    out = sampcnn_forward(x, packed)
    out = jax.block_until_ready(out)

    assert out.shape == (BATCH, NUM_CLASSES), out.shape
    assert bool(jnp.all(jnp.isfinite(out)))

    ref = _reference_forward(x, params)
    assert bool(jnp.allclose(out, ref, rtol=5e-2, atol=5e-2)), (out, ref)

    print("KERNEL_OK")
</pallas_src>

<mosaic_0001>
module attributes {stable_mosaic.version = 11 : i64} {
  func.func @_fused_forward_kernel(%arg0: memref<18x3xf32, #tpu.memory_space<vmem>>, %arg1: memref<136x32xf32, #tpu.memory_space<vmem>>, %arg2: memref<2x10xf32, #tpu.memory_space<vmem>>) attributes {dimension_semantics = [], scalar_prefetch = 0 : i64, scratch_operands = 0 : i64, tpu.core_type = #tpu.core_type<tc>} {
    %c0 = arith.constant 0 : index
    %c0_0 = arith.constant 0 : index
    %0 = vector.load %arg1[%c0, %c0_0] : memref<136x32xf32, #tpu.memory_space<vmem>>, vector<3x8xf32>
    %c8 = arith.constant 8 : index
    %c0_1 = arith.constant 0 : index
    %1 = vector.load %arg1[%c8, %c0_1] : memref<136x32xf32, #tpu.memory_space<vmem>>, vector<24x16xf32>
    %c32 = arith.constant 32 : index
    %c0_2 = arith.constant 0 : index
    %2 = vector.load %arg1[%c32, %c0_2] : memref<136x32xf32, #tpu.memory_space<vmem>>, vector<48x16xf32>
    %c80 = arith.constant 80 : index
    %c0_3 = arith.constant 0 : index
    %3 = vector.load %arg1[%c80, %c0_3] : memref<136x32xf32, #tpu.memory_space<vmem>>, vector<16x32xf32>
    %c96 = arith.constant 96 : index
    %c0_4 = arith.constant 0 : index
    %4 = vector.load %arg1[%c96, %c0_4] : memref<136x32xf32, #tpu.memory_space<vmem>>, vector<32x10xf32>
    %c128 = arith.constant 128 : index
    %c0_5 = arith.constant 0 : index
    %5 = vector.load %arg1[%c128, %c0_5] : memref<136x32xf32, #tpu.memory_space<vmem>>, vector<1x8xf32>
    %c129 = arith.constant 129 : index
    %c0_6 = arith.constant 0 : index
    %6 = vector.load %arg1[%c129, %c0_6] : memref<136x32xf32, #tpu.memory_space<vmem>>, vector<1x8xf32>
    %c130 = arith.constant 130 : index
    %c0_7 = arith.constant 0 : index
    %7 = vector.load %arg1[%c130, %c0_7] : memref<136x32xf32, #tpu.memory_space<vmem>>, vector<1x16xf32>
    %c131 = arith.constant 131 : index
    %c0_8 = arith.constant 0 : index
    %8 = vector.load %arg1[%c131, %c0_8] : memref<136x32xf32, #tpu.memory_space<vmem>>, vector<1x16xf32>
    %c132 = arith.constant 132 : index
    %c0_9 = arith.constant 0 : index
    %9 = vector.load %arg1[%c132, %c0_9] : memref<136x32xf32, #tpu.memory_space<vmem>>, vector<1x16xf32>
    %c133 = arith.constant 133 : index
    %c0_10 = arith.constant 0 : index
    %10 = vector.load %arg1[%c133, %c0_10] : memref<136x32xf32, #tpu.memory_space<vmem>>, vector<1x16xf32>
    %c134 = arith.constant 134 : index
    %c0_11 = arith.constant 0 : index
    %11 = vector.load %arg1[%c134, %c0_11] : memref<136x32xf32, #tpu.memory_space<vmem>>, vector<1x32xf32>
    %c0_12 = arith.constant 0 : index
    %c0_13 = arith.constant 0 : index
    %12 = vector.load %arg0[%c0_12, %c0_13] : memref<18x3xf32, #tpu.memory_space<vmem>>, vector<18x3xf32>
    %cst = arith.constant dense<0.000000e+00> : vector<18x8xf32>
    %13 = tpu.matmul %12, %0, %cst {dimension_numbers = #tpu.dot_dimension_numbers<[1], [0], [0], [1], [0, 0, 1, 1], [], []>} : vector<18x3xf32>, vector<3x8xf32>, vector<18x8xf32> -> vector<18x8xf32>
    %14 = vector.broadcast %5 : vector<1x8xf32> to vector<18x8xf32>
    %15 = arith.addf %13, %14 : vector<18x8xf32>
    %cst_14 = arith.constant 0.000000e+00 : f32
    %16 = vector.broadcast %cst_14 : f32 to vector<18x8xf32>
    %17 = arith.cmpf oge, %15, %16 : vector<18x8xf32>
    %18 = vector.broadcast %6 : vector<1x8xf32> to vector<18x8xf32>
    %19 = arith.mulf %18, %15 : vector<18x8xf32>
    %20 = arith.select %17, %15, %19 : vector<18x8xi1>, vector<18x8xf32>
    %cst_15 = arith.constant 0.000000e+00 : f32
    %21 = vector.broadcast %cst_15 : f32 to vector<1x8xf32>
    %22 = tpu.iota {dimensions = array<i32: 0>} : vector<18x8xi32>
    %23 = vector.extract_strided_slice %20 {offsets = [0, 0], sizes = [17, 8], strides = [1, 1]} : vector<18x8xf32> to vector<17x8xf32>
    %24 = tpu.concatenate %21, %23 in 0 : vector<1x8xf32>, vector<17x8xf32> -> vector<18x8xf32>
    %c0_i32 = arith.constant 0 : i32
    %25 = vector.broadcast %c0_i32 : i32 to vector<18x8xi32>
    %26 = arith.cmpi eq, %22, %25 : vector<18x8xi32>
    %c9_i32 = arith.constant 9 : i32
    %27 = vector.broadcast %c9_i32 : i32 to vector<18x8xi32>
    %28 = arith.cmpi eq, %22, %27 : vector<18x8xi32>
    %29 = arith.ori %26, %28 : vector<18x8xi1>
    %cst_16 = arith.constant 0.000000e+00 : f32
    %30 = vector.broadcast %cst_16 : f32 to vector<18x8xf32>
    %31 = arith.select %29, %30, %24 : vector<18x8xi1>, vector<18x8xf32>
    %32 = vector.extract_strided_slice %20 {offsets = [1, 0], sizes = [17, 8], strides = [1, 1]} : vector<18x8xf32> to vector<17x8xf32>
    %33 = tpu.concatenate %32, %21 in 0 : vector<17x8xf32>, vector<1x8xf32> -> vector<18x8xf32>
    %c8_i32 = arith.constant 8 : i32
    %34 = vector.broadcast %c8_i32 : i32 to vector<18x8xi32>
    %35 = arith.cmpi eq, %22, %34 : vector<18x8xi32>
    %c17_i32 = arith.constant 17 : i32
    %36 = vector.broadcast %c17_i32 : i32 to vector<18x8xi32>
    %37 = arith.cmpi eq, %22, %36 : vector<18x8xi32>
    %38 = arith.ori %35, %37 : vector<18x8xi1>
    %cst_17 = arith.constant 0.000000e+00 : f32
    %39 = vector.broadcast %cst_17 : f32 to vector<18x8xf32>
    %40 = arith.select %38, %39, %33 : vector<18x8xi1>, vector<18x8xf32>
    %41 = tpu.concatenate %31, %20, %40 in 1 : vector<18x8xf32>, vector<18x8xf32>, vector<18x8xf32> -> vector<18x24xf32>
    %cst_18 = arith.constant dense<0.000000e+00> : vector<18x16xf32>
    %42 = tpu.matmul %41, %1, %cst_18 {dimension_numbers = #tpu.dot_dimension_numbers<[1], [0], [0], [1], [0, 0, 1, 1], [], []>} : vector<18x24xf32>, vector<24x16xf32>, vector<18x16xf32> -> vector<18x16xf32>
    %43 = vector.broadcast %7 : vector<1x16xf32> to vector<18x16xf32>
    %44 = arith.addf %42, %43 : vector<18x16xf32>
    %cst_19 = arith.constant 0.000000e+00 : f32
    %45 = vector.broadcast %cst_19 : f32 to vector<18x16xf32>
    %46 = arith.cmpf oge, %44, %45 : vector<18x16xf32>
    %47 = vector.broadcast %8 : vector<1x16xf32> to vector<18x16xf32>
    %48 = arith.mulf %47, %44 : vector<18x16xf32>
    %49 = arith.select %46, %44, %48 : vector<18x16xi1>, vector<18x16xf32>
    %50 = vector.extract_strided_slice %49 {offsets = [0, 0], sizes = [3, 16], strides = [1, 1]} : vector<18x16xf32> to vector<3x16xf32>
    %cst_20 = arith.constant dense<0xFF800000> : vector<16xf32>
    %51 = vector.multi_reduction <maximumf>, %50, %cst_20 [0] : vector<3x16xf32> to vector<16xf32>
    %52 = vector.shape_cast %51 : vector<16xf32> to vector<1x16xf32>
    %53 = vector.extract_strided_slice %49 {offsets = [3, 0], sizes = [3, 16], strides = [1, 1]} : vector<18x16xf32> to vector<3x16xf32>
    %cst_21 = arith.constant dense<0xFF800000> : vector<16xf32>
    %54 = vector.multi_reduction <maximumf>, %53, %cst_21 [0] : vector<3x16xf32> to vector<16xf32>
    %55 = vector.shape_cast %54 : vector<16xf32> to vector<1x16xf32>
    %56 = vector.extract_strided_slice %49 {offsets = [6, 0], sizes = [3, 16], strides = [1, 1]} : vector<18x16xf32> to vector<3x16xf32>
    %cst_22 = arith.constant dense<0xFF800000> : vector<16xf32>
    %57 = vector.multi_reduction <maximumf>, %56, %cst_22 [0] : vector<3x16xf32> to vector<16xf32>
    %58 = vector.shape_cast %57 : vector<16xf32> to vector<1x16xf32>
    %59 = vector.extract_strided_slice %49 {offsets = [9, 0], sizes = [3, 16], strides = [1, 1]} : vector<18x16xf32> to vector<3x16xf32>
    %cst_23 = arith.constant dense<0xFF800000> : vector<16xf32>
    %60 = vector.multi_reduction <maximumf>, %59, %cst_23 [0] : vector<3x16xf32> to vector<16xf32>
    %61 = vector.shape_cast %60 : vector<16xf32> to vector<1x16xf32>
    %62 = vector.extract_strided_slice %49 {offsets = [12, 0], sizes = [3, 16], strides = [1, 1]} : vector<18x16xf32> to vector<3x16xf32>
    %cst_24 = arith.constant dense<0xFF800000> : vector<16xf32>
    %63 = vector.multi_reduction <maximumf>, %62, %cst_24 [0] : vector<3x16xf32> to vector<16xf32>
    %64 = vector.shape_cast %63 : vector<16xf32> to vector<1x16xf32>
    %65 = vector.extract_strided_slice %49 {offsets = [15, 0], sizes = [3, 16], strides = [1, 1]} : vector<18x16xf32> to vector<3x16xf32>
    %cst_25 = arith.constant dense<0xFF800000> : vector<16xf32>
    %66 = vector.multi_reduction <maximumf>, %65, %cst_25 [0] : vector<3x16xf32> to vector<16xf32>
    %67 = vector.shape_cast %66 : vector<16xf32> to vector<1x16xf32>
    %68 = tpu.concatenate %52, %55, %58, %61, %64, %67 in 0 : vector<1x16xf32>, vector<1x16xf32>, vector<1x16xf32>, vector<1x16xf32>, vector<1x16xf32>, vector<1x16xf32> -> vector<6x16xf32>
    %cst_26 = arith.constant 0.000000e+00 : f32
    %69 = vector.broadcast %cst_26 : f32 to vector<1x16xf32>
    %70 = tpu.iota {dimensions = array<i32: 0>} : vector<6x16xi32>
    %71 = vector.extract_strided_slice %68 {offsets = [0, 0], sizes = [5, 16], strides = [1, 1]} : vector<6x16xf32> to vector<5x16xf32>
    %72 = tpu.concatenate %69, %71 in 0 : vector<1x16xf32>, vector<5x16xf32> -> vector<6x16xf32>
    %c0_i32_27 = arith.constant 0 : i32
    %73 = vector.broadcast %c0_i32_27 : i32 to vector<6x16xi32>
    %74 = arith.cmpi eq, %70, %73 : vector<6x16xi32>
    %c3_i32 = arith.constant 3 : i32
    %75 = vector.broadcast %c3_i32 : i32 to vector<6x16xi32>
    %76 = arith.cmpi eq, %70, %75 : vector<6x16xi32>
    %77 = arith.ori %74, %76 : vector<6x16xi1>
    %cst_28 = arith.constant 0.000000e+00 : f32
    %78 = vector.broadcast %cst_28 : f32 to vector<6x16xf32>
    %79 = arith.select %77, %78, %72 : vector<6x16xi1>, vector<6x16xf32>
    %80 = vector.extract_strided_slice %68 {offsets = [1, 0], sizes = [5, 16], strides = [1, 1]} : vector<6x16xf32> to vector<5x16xf32>
    %81 = tpu.concatenate %80, %69 in 0 : vector<5x16xf32>, vector<1x16xf32> -> vector<6x16xf32>
    %c2_i32 = arith.constant 2 : i32
    %82 = vector.broadcast %c2_i32 : i32 to vector<6x16xi32>
    %83 = arith.cmpi eq, %70, %82 : vector<6x16xi32>
    %c5_i32 = arith.constant 5 : i32
    %84 = vector.broadcast %c5_i32 : i32 to vector<6x16xi32>
    %85 = arith.cmpi eq, %70, %84 : vector<6x16xi32>
    %86 = arith.ori %83, %85 : vector<6x16xi1>
    %cst_29 = arith.constant 0.000000e+00 : f32
    %87 = vector.broadcast %cst_29 : f32 to vector<6x16xf32>
    %88 = arith.select %86, %87, %81 : vector<6x16xi1>, vector<6x16xf32>
    %89 = tpu.concatenate %79, %68, %88 in 1 : vector<6x16xf32>, vector<6x16xf32>, vector<6x16xf32> -> vector<6x48xf32>
    %cst_30 = arith.constant dense<0.000000e+00> : vector<6x16xf32>
    %90 = tpu.matmul %89, %2, %cst_30 {dimension_numbers = #tpu.dot_dimension_numbers<[1], [0], [0], [1], [0, 0, 1, 1], [], []>} : vector<6x48xf32>, vector<48x16xf32>, vector<6x16xf32> -> vector<6x16xf32>
    %91 = vector.broadcast %9 : vector<1x16xf32> to vector<6x16xf32>
    %92 = arith.addf %90, %91 : vector<6x16xf32>
    %cst_31 = arith.constant 0.000000e+00 : f32
    %93 = vector.broadcast %cst_31 : f32 to vector<6x16xf32>
    %94 = arith.cmpf oge, %92, %93 : vector<6x16xf32>
    %95 = vector.broadcast %10 : vector<1x16xf32> to vector<6x16xf32>
    %96 = arith.mulf %95, %92 : vector<6x16xf32>
    %97 = arith.select %94, %92, %96 : vector<6x16xi1>, vector<6x16xf32>
    %98 = vector.extract_strided_slice %97 {offsets = [0, 0], sizes = [3, 16], strides = [1, 1]} : vector<6x16xf32> to vector<3x16xf32>
    %cst_32 = arith.constant dense<0xFF800000> : vector<16xf32>
    %99 = vector.multi_reduction <maximumf>, %98, %cst_32 [0] : vector<3x16xf32> to vector<16xf32>
    %100 = vector.shape_cast %99 : vector<16xf32> to vector<1x16xf32>
    %101 = vector.extract_strided_slice %97 {offsets = [3, 0], sizes = [3, 16], strides = [1, 1]} : vector<6x16xf32> to vector<3x16xf32>
    %cst_33 = arith.constant dense<0xFF800000> : vector<16xf32>
    %102 = vector.multi_reduction <maximumf>, %101, %cst_33 [0] : vector<3x16xf32> to vector<16xf32>
    %103 = vector.shape_cast %102 : vector<16xf32> to vector<1x16xf32>
    %104 = tpu.concatenate %100, %103 in 0 : vector<1x16xf32>, vector<1x16xf32> -> vector<2x16xf32>
    %cst_34 = arith.constant dense<0.000000e+00> : vector<2x32xf32>
    %105 = tpu.matmul %104, %3, %cst_34 {dimension_numbers = #tpu.dot_dimension_numbers<[1], [0], [0], [1], [0, 0, 1, 1], [], []>} : vector<2x16xf32>, vector<16x32xf32>, vector<2x32xf32> -> vector<2x32xf32>
    %106 = vector.broadcast %11 : vector<1x32xf32> to vector<2x32xf32>
    %107 = arith.addf %105, %106 : vector<2x32xf32>
    %108 = arith.mulf %107, %107 : vector<2x32xf32>
    %cst_35 = arith.constant dense<0.000000e+00> : vector<2xf32>
    %109 = vector.multi_reduction <add>, %108, %cst_35 [1] : vector<2x32xf32> to vector<2xf32>
    %110 = vector.shape_cast %109 : vector<2xf32> to vector<2x1xf32>
    %cst_36 = arith.constant 9.99999996E-13 : f32
    %111 = vector.broadcast %cst_36 : f32 to vector<2x1xf32>
    %112 = arith.addf %110, %111 : vector<2x1xf32>
    %113 = math.rsqrt %112 : vector<2x1xf32>
    %114 = vector.broadcast %113 : vector<2x1xf32> to vector<2x32xf32>
    %115 = arith.mulf %107, %114 : vector<2x32xf32>
    %cst_37 = arith.constant dense<0.000000e+00> : vector<2x10xf32>
    %116 = tpu.matmul %115, %4, %cst_37 {dimension_numbers = #tpu.dot_dimension_numbers<[1], [0], [0], [1], [0, 0, 1, 1], [], []>} : vector<2x32xf32>, vector<32x10xf32>, vector<2x10xf32> -> vector<2x10xf32>
    %c0_38 = arith.constant 0 : index
    %c0_39 = arith.constant 0 : index
    %117 = vector.load %arg2[%c0_38, %c0_39] : memref<2x10xf32, #tpu.memory_space<vmem>>, vector<2x10xf32>
    tpu.vector_store %arg2[%c0_38, %c0_39], %116 {strides = array<i32>} : memref<2x10xf32, #tpu.memory_space<vmem>>, vector<2x10xf32>,
    return
  }
}

</mosaic_0001>

<bundles_post_ra>
// kernel: tpu_custom_call.1
= control target key start
LH: loop header
LB: loop body
LE: loop exit
PB: predicated region body
PF: predicated region fallthrough
CT: control target
= control target key end

     0   :  { %vm52_vm0 = vcmask 1042432   ;;  %v827_v2 = vmov 0.0   ;;  %vm828_vm1 = vmmov 0   ;;  %vm42_vm2 = vcmask 23552   ;;  %s1012_s0 = inlined_call_operand.vmem [shape: f32[18,3], index: 0, kind: input, shape index: {}]   ;;  %s1013_s1 = inlined_call_operand.vmem [shape: f32[136,32], index: 1, kind: input, shape index: {}]   ;;  %s1014_s2 = inlined_call_operand.hbm [shape: f32[2,10], index: 2, kind: output, shape index: {}]  }
   0x1   :  { %v12_v0 = vld [vmem:[%s1013_s1] sm:$0x7]  ;;  %738 = vmatprep.subr.mxu0 %v827_v2  ;;  %740 = vmatprep.mubr.msk.f32.mxu0 %vm828_vm1, %v827_v2 }
   0x2   :  { %v35_v1 = vld [vmem:[%s1012_s0] sm:$0xff]  ;;  %739 = vmatpush3.msk.msra.mxu0 %vm52_vm0, %v12_v0  ;;  %749 = vmatprep.subr.mxu1 %v827_v2 }
   0x3   :  { %7 = vsyncpa [#allocation3], 0  ;;  %741 = vmatmul.mubr.msk.f32.vlgmr.msra.gmra.mxu0 %vm42_vm2, %v35_v1  ;;  %755 = vmatprep.mubr.msk.f32.mxu1 %vm828_vm1, %v827_v2  ;;  %v36_v3 = vld [vmem:[%s1012_s0 + $0x8] sm:$0xff]  ;;  %v37_v4 = vld [vmem:[%s1012_s0 + $0x10] sm:$0x3]  ;;  %v149_v8 = vlaneseq  ;;  %s829_s26 = smov 8  }
   0x4   :  { %743 = vmatprep.mubr.msk.f32.mxu0 %vm828_vm1, %v827_v2  ;;  %764 = vmatprep.subr.mxu0 %v827_v2  ;;  %v15_v5 = vld [vmem:[%s1013_s1 + $0x18] sm:$0xff]  ;;  %v14_v6 = vld [vmem:[%s1013_s1 + $0x10] sm:$0xff]  ;;  %v696_v7 = vld [vmem:[%s1013_s1 + $0x80] ss:$0 sm:$0xff]  ;;  %vm178_vm5 = vcmask 1046528   ;;  %vm156_vm8 = vcmask 1040384  }
   0x5   :  { %750 = vmatpush3.msra.mxu1 %v15_v5  ;;  %v13_v9 = vld [vmem:[%s1013_s1 + $0x8] sm:$0xff]  ;;  %v701_v10 = vld [vmem:[%s1013_s1 + $0x81] ss:$0 sm:$0xff]  ;;  %v892_v15 = vshrl.u32 %v149_v8, 7  ;;  %s830_s27 = smov 16   ;;  %vm221_vm12 = vcmask 64512  }
   0x6   :  { %751 = vmatprep.subr.mxu1 %v827_v2  ;;  %vm225_vm13 = vcmask 130048   ;;  %vm233_vm14 = vcmask 195584   ;;  %v21_v57 = vld [vmem:[%s1013_s1 + $0x48] sm:$0xff]  ;;  %v20_v58 = vld [vmem:[%s1013_s1 + $0x40] sm:$0xff]  ;;  %v19_v59 = vld [vmem:[%s1013_s1 + $0x38] sm:$0xff]  ;;  %s831_s16 = smov 32  }
   0x7   :  { %744 = vmatmul.mubr.msk.f32.gmra.mxu0 %vm42_vm2, %v36_v3  ;;  %752 = vmatpush3.msra.mxu1 %v14_v6  ;;  %v151_v19 = vadd.s32 8, %v892_v15  ;;  %v152_v37 = vadd.s32 16, %v892_v15  ;;  %vm166_vm11 = vcmp.eq.s32.totalorder %v892_v15, 0  ;;  %v18_v60 = vld [vmem:[%s1013_s1 + $0x30] sm:$0xff]  ;;  %v702_v61 = vld [vmem:[%s1013_s1 + $0x82] ss:$0 sm:$0xff] }
   0x8   :  { %746 = vmatprep.mubr.msk.f32.mxu0 %vm828_vm1, %v827_v2  ;;  %753 = vmatprep.subr.mxu1 %v827_v2  ;;  %v706_v62 = vld [vmem:[%s1013_s1 + $0x83] ss:$0 sm:$0xff]  ;;  %s832_s6 = smov [#allocation2]  }
   0x9   :  { %754 = vmatpush3.msra.mxu1 %v13_v9  ;;  %vm170_vm6 = vcmp.eq.s32.totalorder %v151_v19, 9  ;;  %vm189_vm9 = vcmp.eq.s32.totalorder %v151_v19, 8  ;;  %vm193_vm10 = vcmp.eq.s32.totalorder %v152_v37, 17  ;;  %765 = vmatpush3.msra.mxu0 %v21_v57  ;;  %s688_s7 = sshll.u32 %s832_s6, 4  ;;  %s689_s7 = int_to_ptr.vmem [resolvable:$true] %s688_s7 }
   0xa   :  { %786 = vmatprep.subr.mxu1 %v827_v2  ;;  %766 = vmatprep.subr.mxu0 %v827_v2  ;;  %s805_s8 = scalar_lea.vmem %s689_s7, 32  ;;  %p810_p1 = scmp.lt.s32.totalorder %s689_s7, %s689_s7 }
   0xb   :  { %747 = vmatmul.mubr.msk.f32.gmra.mxu0 %vm42_vm2, %v37_v4  ;;  %vm336_vm2 = vcmask 124928   ;;  %p806_p0 = scmp.ne.s32.totalorder %s689_s7, %s805_s8  ;;  %p811_p2 = scmp.lt.s32.totalorder %s805_s8, %s805_s8 }
   0xc   :  { %776 = vmatprep.mubr.msk.f32.mxu0 %vm828_vm1, %v827_v2  ;;  %767 = vmatpush3.msra.mxu0 %v20_v58 }
   0xd   :  { %768 = vmatprep.subr.mxu0 %v827_v2  ;;  %p812_p3 = por %p811_p2, %p810_p1 }
   0xe   :  { %769 = vmatpush3.msra.mxu0 %v19_v59 }
   0xf   :  { %770 = vmatprep.subr.mxu0 %v827_v2  ;;  %p813_p4 = pnand %p812_p3, %p806_p0 }
  0x10   :  { %771 = vmatpush3.msra.mxu0 %v18_v60 }
  0x11   :  { %772 = vmatprep.subr.mxu0 %v827_v2 }
  0xc3   :  { %v122_v11 = vpop.f32.mrf.mxu0 }
  0xc4   :  { %v123_v12 = vadd.f32 %v696_v7, %v122_v11 }
  0xc5   :  { %v742_v13 = vpop.f32.mrf.mxu0 }
  0xc6   :  { %v143_v14 = vmul.f32 %v701_v10, %v123_v12  ;;  %vm136_vm3 = vcmp.ge.f32.partialorder %v123_v12, 0.0 }
  0xc7   :  { %v127_v16 = vpop.f32.mrf.mxu0 }
  0xc8   :  { %v128_v17 = vadd.f32 %v696_v7, %v127_v16  ;;  %v146_v18 = vsel %vm136_vm3, %v123_v12, %v143_v14  ;;  %vm344_vm3 = vcmask 128003  }
  0xc9   :  { %200 = vrot.lane.b32.xlu0 %v146_v18, %s829_s26  ;;  %v745_v20 = vpop.f32.mrf.mxu0  ;;  %v157_v25 = vrot.slane %v146_v18, 7  ;;  %v179_v26 = vrot.slane %v146_v18, 1 }
  0xca   :  { %v144_v21 = vmul.f32 %v701_v10, %v128_v17  ;;  %vm137_vm4 = vcmp.ge.f32.partialorder %v128_v17, 0.0 }
  0xcb   :  { %v132_v22 = vpop.f32.mrf.mxu0  ;;  %v165_v44 = vsel %vm156_vm8, 0.0, %v157_v25 }
  0xcc   :  { %v133_v23 = vadd.f32 %v696_v7, %v132_v22  ;;  %v147_v24 = vsel %vm137_vm4, %v128_v17, %v144_v21  ;;  %v175_v45 = vsel %vm166_vm11, 0.0, %v165_v44  ;;  %vm352_vm4 = vcmask 130054  }
  0xcd   :  { %202 = vrot.lane.b32.xlu1 %v147_v24, %s829_s26  ;;  %v158_v27 = vrot.slane %v147_v24, 7  ;;  %v180_v28 = vrot.slane %v147_v24, 1  ;;  %v748_v29 = vpop.f32.mrf.mxu0 }
  0xce   :  { %v145_v30 = vmul.f32 %v701_v10, %v133_v23  ;;  %vm138_vm7 = vcmp.ge.f32.partialorder %v133_v23, 0.0 }
  0xcf   :  { %v181_v31 = vsel %vm178_vm5, %v179_v26, %v180_v28  ;;  %v159_v32 = vsel %vm156_vm8, %v157_v25, %v158_v27 }
  0xd0   :  { %212 = vrot.lane.b32.xlu0 %v181_v31, %s830_s27  ;;  %v148_v33 = vsel %vm138_vm7, %v133_v23, %v145_v30  ;;  %v176_v34 = vsel %vm170_vm6, 0.0, %v159_v32  ;;  %vm354_vm6 = vcmask 122880   ;;  %vm363_vm7 = vcmask 125953  }
  0xd1   :  { %v160_v35 = vrot.slane %v148_v33, 7  ;;  %v182_v36 = vrot.slane %v148_v33, 1 }
  0xd3   :  { %v183_v38 = vsel %vm178_vm5, %v180_v28, %v182_v36  ;;  %v161_v39 = vsel %vm156_vm8, %v158_v27, %v160_v35  ;;  %v187_v41 = vsel %vm156_vm8, %v182_v36, 0.0 }
  0xd4   :  { %204 = vrot.lane.b32.xlu0 %v148_v33, %s829_s26  ;;  %v198_v40 = vsel %vm189_vm9, 0.0, %v183_v38  ;;  %v199_v42 = vsel %vm193_vm10, 0.0, %v187_v41  ;;  %vm371_vm9 = vcmask 129028   ;;  %vm379_vm10 = vcmask 130055  }
  0xd5   :  { %214 = vrot.lane.b32.xlu1 %v198_v40, %s830_s27 }
  0xd9   :  { %216 = vrot.lane.b32.xlu1 %v199_v42, %s830_s27 }
 0x13b   :  { %v201_v43 = vpop.permute.xlu0 %200 }
 0x13c   :  { %v222_v46 = vsel %vm221_vm12, %v175_v45, %v201_v43 }
 0x13f   :  { %v203_v48 = vpop.permute.xlu1 %202 }
 0x140   :  { %v223_v50 = vsel %vm221_vm12, %v176_v34, %v203_v48  ;;  %v17_v48 = vld [vmem:[%s1013_s1 + $0x28] sm:$0xff] }
 0x141   :  { %773 = vmatpush3.msra.mxu0 %v17_v48  ;;  %v25_v48 = vld [vmem:[%s1013_s1 + $0x68] sm:$0xff] }
 0x142   :  { %v213_v47 = vpop.permute.xlu0 %212  ;;  %774 = vmatprep.subr.mxu0 %v827_v2 }
 0x143   :  { %v226_v49 = vsel %vm225_vm13, %v222_v46, %v213_v47 }
 0x144   :  { %756 = vmatmul.mubr.msk.f32.vlgmr.msra.gmra.mxu1 %vm233_vm14, %v226_v49  ;;  %v16_v49 = vld [vmem:[%s1013_s1 + $0x20] sm:$0xff] }
 0x145   :  { %758 = vmatprep.mubr.msk.f32.mxu1 %vm828_vm1, %v827_v2  ;;  %775 = vmatpush3.msra.mxu0 %v16_v49  ;;  %v24_v49 = vld [vmem:[%s1013_s1 + $0x60] sm:$0xff] }
 0x146   :  { %v205_v52 = vpop.permute.xlu0 %204  ;;  %779 = vmatprep.subr.mxu0 %v827_v2 }
 0x147   :  { %v215_v51 = vpop.permute.xlu1 %214  ;;  %v224_v54 = vsel %vm221_vm12, %v161_v39, %v205_v52  ;;  %vm381_vm12 = vcmask 123904  }
 0x148   :  { %v227_v53 = vsel %vm225_vm13, %v223_v50, %v215_v51 }
 0x149   :  { %759 = vmatmul.mubr.msk.f32.gmra.mxu1 %vm233_vm14, %v227_v53 }
 0x14a   :  { %761 = vmatprep.mubr.msk.f32.mxu1 %vm828_vm1, %v827_v2 }
 0x14b   :  { %v217_v55 = vpop.permute.xlu1 %216 }
 0x14c   :  { %v228_v56 = vsel %vm225_vm13, %v224_v54, %v217_v55 }
 0x14d   :  { %762 = vmatmul.mubr.msk.f32.gmra.mxu1 %vm233_vm14, %v228_v56 }
 0x14e   :  { %794 = vmatprep.mubr.msk.f32.mxu1 %vm828_vm1, %v827_v2 }
 0x204   :  { %v309_v63 = vpop.f32.mrf.mxu1 }
 0x205   :  { %v310_v0 = vadd.f32 %v702_v61, %v309_v63 }
 0x206   :  { %v757_v1 = vpop.f32.mrf.mxu1 }
 0x207   :  { %vm323_vm15 = vcmp.ge.f32.partialorder %v310_v0, 0.0  ;;  %v330_v3 = vmul.f32 %v706_v62, %v310_v0 }
 0x209   :  { %v333_v4 = vsel %vm323_vm15, %v310_v0, %v330_v3  ;;  %v314_v5 = vpop.f32.mrf.mxu1  ;;  %vm391_vm15 = vcmask 1041408  }
 0x20a   :  { %v337_v6 = vsel %vm336_vm2, %v333_v4, -inf  ;;  %v345_v7 = vsel %vm344_vm3, %v333_v4, -inf  ;;  %v315_v8 = vadd.f32 %v702_v61, %v314_v5  ;;  %v353_v17 = vsel %vm352_vm4, %v333_v4, -inf }
 0x20b   :  { %v338_v9 = vrot.slane %v337_v6, 4  ;;  %v346_v10 = vrot.slane %v345_v7, 4  ;;  %v760_v11 = vpop.f32.mrf.mxu1  ;;  %vm394_vm4 = vcmask 1043456  }
 0x20c   :  { %vm324_vm5 = vcmp.ge.f32.partialorder %v315_v8, 0.0  ;;  %v331_v12 = vmul.f32 %v706_v62, %v315_v8 }
 0x20d   :  { %v339_v13 = vmax.f32 %v337_v6, %v338_v9  ;;  %v347_v14 = vmax.f32 %v345_v7, %v346_v10  ;;  %v319_v16 = vpop.f32.mrf.mxu1 }
 0x20e   :  { %v334_v18 = vsel %vm324_vm5, %v315_v8, %v331_v12  ;;  %v320_v19 = vadd.f32 %v702_v61, %v319_v16  ;;  %vm396_vm5 = vcmask 1044480  }
 0x20f   :  { %v340_v20 = vrot.slane %v339_v13, 2  ;;  %v348_v21 = vrot.slane %v347_v14, 2  ;;  %v355_v22 = vsel %vm354_vm6, %v334_v18, -inf  ;;  %v364_v23 = vsel %vm363_vm7, %v334_v18, -inf  ;;  %v763_v24 = vpop.f32.mrf.mxu1 }
 0x210   :  { %v356_v25 = vmax.f32 %v353_v17, %v355_v22  ;;  %v365_v26 = vrot.slane %v364_v23, 4  ;;  %v372_v27 = vsel %vm371_vm9, %v334_v18, -inf  ;;  %vm325_vm14 = vcmp.ge.f32.partialorder %v320_v19, 0.0  ;;  %v22_v17 = vld [vmem:[%s1013_s1 + $0x50] sm:$0xff] }
 0x211   :  { %v341_v28 = vmax.f32 %v339_v13, %v340_v20  ;;  %v349_v29 = vmax.f32 %v347_v14, %v348_v21  ;;  %v373_v30 = vrot.slane %v372_v27, 4  ;;  %v332_v31 = vmul.f32 %v706_v62, %v320_v19 }
 0x212   :  { %v357_v32 = vrot.slane %v356_v25, 4  ;;  %v366_v33 = vmax.f32 %v364_v23, %v365_v26  ;;  %v380_v38 = vsel %vm379_vm10, %v334_v18, -inf  ;;  %vm408_vm6 = vcmp.eq.s32.totalorder %v892_v15, 2  ;;  %v707_v18 = vld [vmem:[%s1013_s1 + $0x84] ss:$0 sm:$0xff] }
 0x213   :  { %v374_v34 = vmax.f32 %v372_v27, %v373_v30  ;;  %v335_v35 = vsel %vm325_vm14, %v320_v19, %v332_v31  ;;  %v342_v40 = vrot.slane %v341_v28, 1  ;;  %v350_v41 = vrot.slane %v349_v29, 1  ;;  %v709_v19 = vld [vmem:[%s1013_s1 + $0x85] ss:$0 sm:$0xff] }
 0x214   :  { %v358_v36 = vmax.f32 %v356_v25, %v357_v32  ;;  %v367_v37 = vrot.slane %v366_v33, 2  ;;  %v382_v39 = vsel %vm381_vm12, %v335_v35, -inf  ;;  %vm409_vm7 = vcmp.eq.s32.totalorder %v892_v15, 5 }
 0x215   :  { %v375_v42 = vrot.slane %v374_v34, 2  ;;  %v383_v43 = vmax.f32 %v380_v38, %v382_v39  ;;  %v343_v51 = vmax.f32 %v341_v28, %v342_v40  ;;  %v351_v52 = vmax.f32 %v349_v29, %v350_v41  ;;  %vm410_vm9 = vmor %vm408_vm6, %vm409_vm7  ;;  %v710_v40 = vld [vmem:[%s1013_s1 + $0x86] ss:$0 sm:$0xff] }
 0x216   :  { %v359_v44 = vrot.slane %v358_v36, 2  ;;  %v368_v45 = vmax.f32 %v366_v33, %v367_v37  ;;  %vm402_vm10 = vcmp.eq.s32.totalorder %v892_v15, 3  ;;  %vm420_vm12 = vcmask 261120   ;;  %v23_v15 = vld [vmem:[%s1013_s1 + $0x58] sm:$0xff] }
 0x217   :  { %v384_v46 = vrot.slane %v383_v43, 4  ;;  %v376_v47 = vmax.f32 %v374_v34, %v375_v42  ;;  %v390_v61 = vsel %vm156_vm8, %v343_v51, %v351_v52  ;;  %vm426_vm14 = vcmask 392192  }
 0x218   :  { %v360_v50 = vmax.f32 %v358_v36, %v359_v44  ;;  %v369_v54 = vrot.slane %v368_v45, 1 }
 0x219   :  { %v385_v53 = vmax.f32 %v383_v43, %v384_v46  ;;  %v377_v56 = vrot.slane %v376_v47, 1  ;;  %v27_v46 = vld [vmem:[%s1013_s1 + $0x78] sm:$0xff] }
 0x21a   :  { %v361_v55 = vrot.slane %v360_v50, 1  ;;  %v370_v59 = vmax.f32 %v368_v45, %v369_v54  ;;  %787 = vmatpush3.msra.mxu1 %v27_v46 }
 0x21b   :  { %v386_v57 = vrot.slane %v385_v53, 2  ;;  %v378_v62 = vmax.f32 %v376_v47, %v377_v56  ;;  %788 = vmatprep.subr.mxu1 %v827_v2  ;;  %v26_v47 = vld [vmem:[%s1013_s1 + $0x70] sm:$0xff] }
 0x21c   :  { %v362_v58 = vmax.f32 %v360_v50, %v361_v55  ;;  %789 = vmatpush3.msra.mxu1 %v26_v47 }
 0x21d   :  { %v387_v60 = vmax.f32 %v385_v53, %v386_v57  ;;  %790 = vmatprep.subr.mxu1 %v827_v2 }
 0x21e   :  { %v392_v63 = vsel %vm391_vm15, %v390_v61, %v362_v58  ;;  %791 = vmatpush3.msra.mxu1 %v25_v48 }
 0x21f   :  { %v388_v0 = vrot.slane %v387_v60, 1  ;;  %v393_v1 = vsel %vm52_vm0, %v392_v63, %v370_v59  ;;  %vm403_vm0 = vmor %vm166_vm11, %vm402_vm10  ;;  %vm600_vm11 = vcmask 254976   ;;  %792 = vmatprep.subr.mxu1 %v827_v2 }
 0x220   :  { %v395_v3 = vsel %vm394_vm4, %v393_v1, %v378_v62  ;;  %793 = vmatpush3.msra.mxu1 %v24_v49 }
 0x221   :  { %v389_v4 = vmax.f32 %v387_v60, %v388_v0 }
 0x223   :  { %v397_v5 = vsel %vm396_vm5, %v395_v3, %v389_v4 }
 0x224   :  { %412 = vrot.lane.b32.xlu0 %v397_v5, %s830_s27  ;;  %v405_v6 = vrot.slane %v397_v5, 1  ;;  %v399_v9 = vrot.slane %v397_v5, 7 }
 0x226   :  { %v407_v7 = vsel %vm396_vm5, %v405_v6, 0.0  ;;  %v401_v10 = vsel %vm156_vm8, 0.0, %v399_v9 }
 0x227   :  { %v411_v8 = vsel %vm410_vm9, 0.0, %v407_v7  ;;  %v404_v12 = vsel %vm403_vm0, 0.0, %v401_v10 }
 0x228   :  { %416 = vrot.lane.b32.xlu1 %v411_v8, %s831_s16 }
 0x296   :  { %v413_v11 = vpop.permute.xlu0 %412 }
 0x297   :  { %v419_v13 = vsel %vm225_vm13, %v404_v12, %v413_v11 }
 0x29a   :  { %v417_v14 = vpop.permute.xlu1 %416 }
 0x29b   :  { %v421_v16 = vsel %vm420_vm12, %v419_v13, %v417_v14 }
 0x29c   :  { %777 = vmatmul.mubr.msk.f32.vlgmr.msra.gmra.mxu0 %vm426_vm14, %v421_v16 }
 0x29d   :  { %783 = vmatprep.mubr.msk.f32.mxu0 %vm828_vm1, %v827_v2  ;;  %780 = vmatpush3.msra.mxu0 %v23_v15 }
 0x29e   :  { %781 = vmatprep.subr.mxu0 %v827_v2 }
 0x29f   :  { %782 = vmatpush3.msra.mxu0 %v22_v17 }
 0x35c   :  { %v496_v20 = vpop.f32.mrf.mxu0 }
 0x35d   :  { %v497_v21 = vadd.f32 %v707_v18, %v496_v20 }
 0x35e   :  { %v778_v22 = vpop.f32.mrf.mxu0 }
 0x35f   :  { %vm500_vm1 = vcmp.ge.f32.partialorder %v497_v21, 0.0  ;;  %v505_v23 = vmul.f32 %v709_v19, %v497_v21 }
 0x361   :  { %v506_v24 = vsel %vm500_vm1, %v497_v21, %v505_v23 }
 0x362   :  { %v507_v25 = vsel %vm336_vm2, %v506_v24, -inf  ;;  %v514_v26 = vsel %vm344_vm3, %v506_v24, -inf }
 0x363   :  { %v508_v27 = vrot.slane %v507_v25, 4  ;;  %v515_v28 = vrot.slane %v514_v26, 4 }
 0x365   :  { %v509_v29 = vmax.f32 %v507_v25, %v508_v27  ;;  %v516_v30 = vmax.f32 %v514_v26, %v515_v28 }
 0x367   :  { %v510_v31 = vrot.slane %v509_v29, 2  ;;  %v517_v32 = vrot.slane %v516_v30, 2 }
 0x369   :  { %v511_v33 = vmax.f32 %v509_v29, %v510_v31  ;;  %v518_v34 = vmax.f32 %v516_v30, %v517_v32 }
 0x36b   :  { %v512_v35 = vrot.slane %v511_v33, 1  ;;  %v519_v36 = vrot.slane %v518_v34, 1 }
 0x36d   :  { %v513_v37 = vmax.f32 %v511_v33, %v512_v35  ;;  %v520_v38 = vmax.f32 %v518_v34, %v519_v36 }
 0x36f   :  { %v521_v39 = vsel %vm156_vm8, %v513_v37, %v520_v38  ;;  %vm680_vm8 = vcmask 74752  }
 0x370   :  { %784 = vmatmul.mubr.msk.f32.vlgmr.msra.gmra.mxu0 %vm225_vm13, %v521_v39 }
 0x430   :  { %v595_v41 = vpop.f32.mrf.mxu0 }
 0x431   :  { %v596_v42 = vadd.f32 %v710_v40, %v595_v41 }
 0x432   :  { %v785_v43 = vpop.f32.mrf.mxu0 }
 0x433   :  { %v599_v44 = vmul.f32 %v596_v42, %v596_v42 }
 0x435   :  { %v601_v45 = vsel %vm600_vm11, %v599_v44, 0.0 }
 0x436   :  { %602 = vadd.xlane.f32.xlu0 %v601_v45 }
 0x4bf   :  { %v603_v50 = vpop.xlane.xlu0 %602 }
 0x4c0   :  { %v604_v51 = vadd.f32 1e-12, %v603_v50 }
 0x4c2   :  { %803 = vrsqrt.f32 %v604_v51 }
 0x4cf   :  { %v804_v52 = vpop.eup %803 }
 0x4d0   :  { %v606_v53 = vmul.f32 %v804_v52, %v596_v42 }
 0x4d2   :  { %795 = vmatmul.mubr.msk.f32.vlgmr.msra.gmra.mxu1 %vm420_vm12, %v606_v53 }
 0x592   :  { %v676_v54 = vpop.f32.mrf.mxu1 }
 0x593   :  { %681 = vst.msk [vmem:[#allocation2] sm:$0x3] %vm680_vm8, %v676_v54 }
 0x594   :  { %v796_v55 = vpop.f32.mrf.mxu1 }
 0x595   :  { %816 = shalt.err (!%p813_p4)
}
 0x596   :  { %691 = dma.vmem_to_hbm [thread:$0]  %s689_s7, 32, %s1014_s2, [#allocation3]  }
 0x597   :  { %825 = dma.done.wait [#allocation3], 32  }
 0x598   :  { %826 = vsyncadd [#allocation3], 4294967264 }
 0x599   :  { %695 = vsyncpa [#allocation3], 1 }

</bundles_post_ra>
